<compile_context>
chip_gen: v5e
topology: v5e:2x2
jax: 0.10.0
libtpu: 0.0.40
codegen_flags: <defaults>
</compile_context>

<pallas_src>
import functools

import jax
import jax.numpy as jnp
from jax.experimental import pallas as pl
from jax.experimental.pallas import tpu as pltpu

LANE = 128


def _round_up(x, m):
    return (x + m - 1) // m * m


def _ensemble_kernel(x_ref, w_ens_ref, b_ens_ref, w_reg_ref, b_reg_ref, o_ref):
    # x:     (TB, D)      bf16   (one batch tile per grid step)
    # w_ens: (D, F)       bf16   stacked submodel weights (pre-transposed), F = 3*M
    # b_ens: (1, F)       f32    stacked submodel biases
    # w_reg: (F, 128)     f32    regressor weight, zero-padded to 128 lanes
    # b_reg: (1, 128)     f32    regressor bias, zero-padded
    # o:     (TB, 128)    f32    only [:, :outshape] is meaningful
    #
    # First matmul: bf16 operands, f32 accumulation on the MXU.
    tmp = jnp.dot(x_ref[...], w_ens_ref[...], preferred_element_type=jnp.float32)
    # Bias + ReLU in f32 (v5e VPU has no bf16 elementwise).
    tmp = jnp.maximum(tmp + b_ens_ref[...], 0.0)
    # Regressor matmul in f32; zero-padded columns stay exactly zero.
    out = jnp.dot(tmp, w_reg_ref[...], preferred_element_type=jnp.float32)
    o_ref[...] = (out + b_reg_ref[...]).astype(o_ref.dtype)


def fc_ensemble_forward_pallas(x, w_ens, b_ens, w_reg, b_reg, *, tb=1024):
    B, D = x.shape
    F = w_ens.shape[1]              # 3 * num_models
    outshape = w_reg.shape[1]

    # bf16 only for the traffic-heavy first-matmul operands.
    x_bf = x.astype(jnp.bfloat16)
    w_ens_bf = w_ens.astype(jnp.bfloat16)
    b_ens_f32 = b_ens.astype(jnp.float32)

    # Lane-dense output: pad regressor to 128 output columns with zeros.
    n_out = _round_up(outshape, LANE)
    w_reg_pad = jnp.zeros((F, n_out), jnp.float32).at[:, :outshape].set(
        w_reg.astype(jnp.float32))
    b_reg_pad = jnp.zeros((1, n_out), jnp.float32).at[:, :outshape].set(
        b_reg.astype(jnp.float32))

    # Batch tiling: TB sized comfortably inside v7x's 64 MiB VMEM
    # (per tile: TB*D*2 B in + TB*128*4 B out, double-buffered -> ~1.2 MiB @ 1024).
    tb_eff = min(tb, _round_up(B, 8))
    b_pad = _round_up(B, tb_eff)
    if b_pad != B:
        x_bf = jnp.pad(x_bf, ((0, b_pad - B), (0, 0)))
    grid = (b_pad // tb_eff,)

    cost = pl.CostEstimate(
        flops=2 * b_pad * D * F + 2 * b_pad * F * n_out,
        transcendentals=0,
        bytes_accessed=(b_pad * D * 2            # x (bf16)
                        + D * F * 2              # w_ens (bf16)
                        + F * 4                  # b_ens
                        + F * n_out * 4          # w_reg (padded)
                        + n_out * 4              # b_reg (padded)
                        + b_pad * n_out * 4),    # output
    )

    out = pl.pallas_call(
        _ensemble_kernel,
        out_shape=jax.ShapeDtypeStruct((b_pad, n_out), jnp.float32),
        grid=grid,
        in_specs=[
            pl.BlockSpec((tb_eff, D), lambda i: (i, 0)),   # x: tiled over batch
            pl.BlockSpec((D, F), lambda i: (0, 0)),        # weights stay resident
            pl.BlockSpec((1, F), lambda i: (0, 0)),
            pl.BlockSpec((F, n_out), lambda i: (0, 0)),
            pl.BlockSpec((1, n_out), lambda i: (0, 0)),
        ],
        out_specs=pl.BlockSpec((tb_eff, n_out), lambda i: (i, 0)),
        compiler_params=pltpu.CompilerParams(
            dimension_semantics=("parallel",),     # shard batch tiles over TCs (v7x)
            vmem_limit_bytes=32 * 1024 * 1024,
        ),
        cost_estimate=cost,
    )(x_bf, w_ens_bf, b_ens_f32, w_reg_pad, b_reg_pad)

    return out[:B, :outshape]


def _fc_ensemble_forward_xla(x, w_ens, b_ens, w_reg, b_reg):
    """Plain-XLA path for tiny batches where pallas_call overhead dominates."""
    tmp = jnp.dot(x.astype(jnp.bfloat16), w_ens.astype(jnp.bfloat16),
                  preferred_element_type=jnp.float32) + b_ens
    return jnp.maximum(tmp, 0.0) @ w_reg + b_reg


def fc_ensemble_forward(x, w_ens, b_ens, w_reg, b_reg, *,
                        min_pallas_batch=0, tb=1024):
    # In production set min_pallas_batch ~1024: below that, XLA fusion beats the
    # kernel launch + per-step overhead. The demo uses 0 to exercise the kernel.
    if x.shape[0] < min_pallas_batch:
        return _fc_ensemble_forward_xla(x, w_ens, b_ens, w_reg, b_reg)
    return fc_ensemble_forward_pallas(x, w_ens, b_ens, w_reg, b_reg, tb=tb)


def make_params(key, in_features, num_models, outshape=3):
    """Deterministic synthetic parameters (uniform init, PyTorch-Linear style)."""
    keys = jax.random.split(key, 4)
    per_model_out = 3
    bound_m = 1.0 / jnp.sqrt(in_features)
    w_ens = jax.random.uniform(
        keys[0], (in_features, per_model_out * num_models),
        minval=-bound_m, maxval=bound_m, dtype=jnp.float32)
    b_ens = jax.random.uniform(
        keys[1], (1, per_model_out * num_models),
        minval=-bound_m, maxval=bound_m, dtype=jnp.float32)
    fan_in = per_model_out * num_models
    bound_r = 1.0 / jnp.sqrt(fan_in)
    w_reg = jax.random.uniform(
        keys[2], (fan_in, outshape),
        minval=-bound_r, maxval=bound_r, dtype=jnp.float32)
    b_reg = jax.random.uniform(
        keys[3], (1, outshape),
        minval=-bound_r, maxval=bound_r, dtype=jnp.float32)
    return w_ens, b_ens, w_reg, b_reg


def reference_forward(x, w_ens, b_ens, w_reg, b_reg, num_models):
    """Pure-JAX reference mirroring the PyTorch loop + concat structure.

    Uses the same bf16-operand / f32-accumulate convention for the submodel
    matmuls as the kernel so the comparison isolates kernel correctness.
    """
    per = 3
    xb = x.astype(jnp.bfloat16)
    outs = []
    for m in range(num_models):
        wm = w_ens[:, m * per:(m + 1) * per].astype(jnp.bfloat16)
        bm = b_ens[:, m * per:(m + 1) * per]
        outs.append(jnp.dot(xb, wm, preferred_element_type=jnp.float32) + bm)
    tmp = jnp.concatenate(outs, axis=1)
    return jax.nn.relu(tmp) @ w_reg + b_reg


if __name__ == "__main__":
    key = jax.random.PRNGKey(0)
    k_x, k_p = jax.random.split(key)

    B, D = 8, 32          # batch, input features for each submodel
    NUM_MODELS = 4        # len(model_list)
    OUTSHAPE = 3

    x = jax.random.normal(k_x, (B, D), dtype=jnp.float32)
    w_ens, b_ens, w_reg, b_reg = make_params(k_p, D, NUM_MODELS, OUTSHAPE)

    fwd = jax.jit(functools.partial(fc_ensemble_forward, min_pallas_batch=0))
    out = jax.block_until_ready(fwd(x, w_ens, b_ens, w_reg, b_reg))

    ref = reference_forward(x, w_ens, b_ens, w_reg, b_reg, NUM_MODELS)
    assert out.shape == (B, OUTSHAPE)
    assert jnp.allclose(out, ref, atol=2e-2, rtol=2e-2), (
        f"max abs err = {jnp.max(jnp.abs(out - ref))}")

    print("KERNEL_OK")
</pallas_src>

<mosaic_0001>
module attributes {stable_mosaic.version = 11 : i64} {
  func.func @_ensemble_kernel(%arg0: i32, %arg1: memref<8x32xbf16, #tpu.memory_space<vmem>>, %arg2: memref<32x12xbf16, #tpu.memory_space<vmem>>, %arg3: memref<1x12xf32, #tpu.memory_space<vmem>>, %arg4: memref<12x128xf32, #tpu.memory_space<vmem>>, %arg5: memref<1x128xf32, #tpu.memory_space<vmem>>, %arg6: memref<8x128xf32, #tpu.memory_space<vmem>>) attributes {dimension_semantics = [#tpu.dimension_semantics<parallel>], iteration_bounds = array<i64: 1>, scalar_prefetch = 0 : i64, scratch_operands = 0 : i64, tpu.core_type = #tpu.core_type<tc>, window_params = [{transform_indices = @transform_0, window_bounds = array<i64: 8, 32>}, {pipeline_mode = #tpu.pipeline_mode<synchronous>, transform_indices = @transform_1, window_bounds = array<i64: 32, 12>}, {pipeline_mode = #tpu.pipeline_mode<synchronous>, transform_indices = @transform_2, window_bounds = array<i64: 1, 12>}, {pipeline_mode = #tpu.pipeline_mode<synchronous>, transform_indices = @transform_3, window_bounds = array<i64: 12, 128>}, {pipeline_mode = #tpu.pipeline_mode<synchronous>, transform_indices = @transform_4, window_bounds = array<i64: 1, 128>}, {transform_indices = @transform_5, window_bounds = array<i64: 8, 128>}]} {
    %c0 = arith.constant 0 : index
    %c0_0 = arith.constant 0 : index
    %0 = vector.load %arg1[%c0, %c0_0] : memref<8x32xbf16, #tpu.memory_space<vmem>>, vector<8x32xbf16>
    %c0_1 = arith.constant 0 : index
    %c0_2 = arith.constant 0 : index
    %1 = vector.load %arg2[%c0_1, %c0_2] : memref<32x12xbf16, #tpu.memory_space<vmem>>, vector<32x12xbf16>
    %cst = arith.constant dense<0.000000e+00> : vector<8x12xf32>
    %2 = tpu.matmul %0, %1, %cst {dimension_numbers = #tpu.dot_dimension_numbers<[1], [0], [0], [1], [0, 0, 1, 1], [], []>} : vector<8x32xbf16>, vector<32x12xbf16>, vector<8x12xf32> -> vector<8x12xf32>
    %c0_3 = arith.constant 0 : index
    %c0_4 = arith.constant 0 : index
    %3 = vector.load %arg3[%c0_3, %c0_4] : memref<1x12xf32, #tpu.memory_space<vmem>>, vector<1x12xf32>
    %4 = vector.broadcast %3 : vector<1x12xf32> to vector<8x12xf32>
    %5 = arith.addf %2, %4 : vector<8x12xf32>
    %cst_5 = arith.constant 0.000000e+00 : f32
    %6 = vector.broadcast %cst_5 : f32 to vector<8x12xf32>
    %7 = arith.maximumf %5, %6 : vector<8x12xf32>
    %c0_6 = arith.constant 0 : index
    %c0_7 = arith.constant 0 : index
    %8 = vector.load %arg4[%c0_6, %c0_7] : memref<12x128xf32, #tpu.memory_space<vmem>>, vector<12x128xf32>
    %cst_8 = arith.constant dense<0.000000e+00> : vector<8x128xf32>
    %9 = tpu.matmul %7, %8, %cst_8 {dimension_numbers = #tpu.dot_dimension_numbers<[1], [0], [0], [1], [0, 0, 1, 1], [], []>} : vector<8x12xf32>, vector<12x128xf32>, vector<8x128xf32> -> vector<8x128xf32>
    %c0_9 = arith.constant 0 : index
    %c0_10 = arith.constant 0 : index
    %10 = vector.load %arg5[%c0_9, %c0_10] : memref<1x128xf32, #tpu.memory_space<vmem>>, vector<1x128xf32>
    %11 = vector.broadcast %10 : vector<1x128xf32> to vector<8x128xf32>
    %12 = arith.addf %9, %11 : vector<8x128xf32>
    %c0_11 = arith.constant 0 : index
    %c0_12 = arith.constant 0 : index
    %13 = vector.load %arg6[%c0_11, %c0_12] : memref<8x128xf32, #tpu.memory_space<vmem>>, vector<8x128xf32>
    tpu.vector_store %arg6[%c0_11, %c0_12], %12 {strides = array<i32>} : memref<8x128xf32, #tpu.memory_space<vmem>>, vector<8x128xf32>,
    return
  }
  func.func @transform_0(%arg0: i32) -> (i32, i32) {
    %c0_i32 = arith.constant 0 : i32
    %c0_i32_0 = arith.constant 0 : i32
    return %arg0, %c0_i32 : i32, i32
  }
  func.func @transform_1(%arg0: i32) -> (i32, i32) {
    %c0_i32 = arith.constant 0 : i32
    %c0_i32_0 = arith.constant 0 : i32
    %c0_i32_1 = arith.constant 0 : i32
    return %c0_i32, %c0_i32_0 : i32, i32
  }
  func.func @transform_2(%arg0: i32) -> (i32, i32) {
    %c0_i32 = arith.constant 0 : i32
    %c0_i32_0 = arith.constant 0 : i32
    %c0_i32_1 = arith.constant 0 : i32
    return %c0_i32, %c0_i32_0 : i32, i32
  }
  func.func @transform_3(%arg0: i32) -> (i32, i32) {
    %c0_i32 = arith.constant 0 : i32
    %c0_i32_0 = arith.constant 0 : i32
    %c0_i32_1 = arith.constant 0 : i32
    return %c0_i32, %c0_i32_0 : i32, i32
  }
  func.func @transform_4(%arg0: i32) -> (i32, i32) {
    %c0_i32 = arith.constant 0 : i32
    %c0_i32_0 = arith.constant 0 : i32
    %c0_i32_1 = arith.constant 0 : i32
    return %c0_i32, %c0_i32_0 : i32, i32
  }
  func.func @transform_5(%arg0: i32) -> (i32, i32) {
    %c0_i32 = arith.constant 0 : i32
    %c0_i32_0 = arith.constant 0 : i32
    return %arg0, %c0_i32 : i32, i32
  }
}

</mosaic_0001>

<bundles_post_ra>
// kernel: fc_ensemble_forward.1
= control target key start
LH: loop header
LB: loop body
LE: loop exit
PB: predicated region body
PF: predicated region fallthrough
CT: control target
= control target key end

     0   :  { %vm42_vm0 = vcmask 261120   ;;  %vm70_vm1 = vcmask 1043456   ;;  %vm66_vm2 = vcmask 97280   ;;  %s168_s1 = inlined_call_operand.vmem [shape: bf16[32,12], index: 1, kind: input, shape index: {}]   ;;  %s169_s2 = inlined_call_operand.vmem [shape: f32[1,12], index: 2, kind: input, shape index: {}]   ;;  %s170_s0 = inlined_call_operand.vmem [shape: bf16[8,32], index: 0, kind: input, shape index: {}]   ;;  %s171_s4 = inlined_call_operand.vmem [shape: f32[1,128], index: 4, kind: input, shape index: {}]   ;;  %s172_s3 = inlined_call_operand.vmem [shape: f32[12,128], index: 3, kind: input, shape index: {}]   ;;  %s173_s5 = inlined_call_operand.vmem [shape: f32[8,128], index: 5, kind: output, shape index: {}]  }
   0x1   :  { %v111_v0 = vld [vmem:[%s168_s1 + $0x8] sm:$0xff]  ;;  %v110_v1 = vld [vmem:[%s168_s1] sm:$0xff] }
   0x2   :  { %52 = vmatpush.bf16.msra.mxu0 %v111_v0  ;;  %v21_v2 = vld [vmem:[%s170_s0] sm:$0xf]  ;;  %v61_v3 = vld [vmem:[%s172_s3 + $0x8] sm:$0xf] }
   0x3   :  { %108 = vmatpush.msk.msra.mxu1 %vm70_vm1, %v61_v3  ;;  %v60_v4 = vld [vmem:[%s172_s3] sm:$0xff] }
   0x4   :  { %v112_v5 = vld [vmem:[%s169_s2] ss:$0 sm:$0xff] }
   0x5   :  { %89 = vmatpush.msra.mxu1 %v60_v4  ;;  %v113_v10 = vld [vmem:[%s171_s4] ss:$0 sm:$0xff] }
   0x6   :  { %53 = vmatpush.bf16.msra.mxu0 %v110_v1 }
   0x9   :  { %107 = vmatmul.msk.bf16.vlgmr.msra.gmra.mxu0 %vm42_vm0, %v21_v2 }
  0x86   :  { %v55_v6 = vpop.f32.mrf.mxu0 }
  0x87   :  { %v56_v7 = vadd.f32 %v112_v5, %v55_v6 }
  0x89   :  { %v59_v8 = vmax.f32 %v56_v7, 0.0 }
  0x8b   :  { %109 = vmatmul.msk.f32.vlgmr.msra.gmra.mxu1 %vm66_vm2, %v59_v8 }
  0x8e   :  { %v57_v9 = vpop.f32.mrf.mxu0 }
 0x108   :  { %v91_v11 = vpop.f32.mrf.mxu1 }
 0x109   :  { %v92_v12 = vadd.f32 %v113_v10, %v91_v11 }
 0x10b   :  { %94 = vst [vmem:[%s173_s5] sm:$0xff] %v92_v12 }

</bundles_post_ra>
